<compile_context>
chip_gen: v6e
topology: v6e:2x2x1
jax: 0.10.0
libtpu: 0.0.40
codegen_flags: <defaults>
</compile_context>

<pallas_src>
import math

import jax
import jax.numpy as jnp
from jax.experimental import pallas as pl
from jax.experimental.pallas import tpu as pltpu

_LN_EPS = 1e-6                      # matches nn.LayerNorm(d_model, eps=1e-06)


def _layer_norm(v, g, b):
    # Keep all elementwise math in f32 (v5e has no bf16 VPU/EUP path).
    mu = jnp.mean(v, axis=-1, keepdims=True)
    var = jnp.mean((v - mu) ** 2, axis=-1, keepdims=True)
    return (v - mu) * jax.lax.rsqrt(var + _LN_EPS) * g + b


def _select_config():
    """Per-TPU-generation tile sizes and VMEM limit."""
    try:
        vmem_cap = int(pltpu.get_tpu_info().vmem_capacity_bytes)
    except Exception:
        vmem_cap = 128 * 1024 * 1024
    try:
        kind = jax.devices()[0].device_kind.lower()
    except Exception:
        kind = ""
    is_v5e = ("v5 lite" in kind) or ("v5e" in kind) or ("v5lite" in kind)
    if vmem_cap <= 64 * 1024 * 1024:
        # v7x-class: 64 MiB VMEM / TensorCore, 2x256^2 MXU -> 256 attention tiles,
        # smaller seq tiles and a conservative 40 MiB scoped-VMEM cap.
        return dict(seq_tile=256, q_tile=256, k_tile=256, ff_tile=1024,
                    vmem_limit=40 * 1024 * 1024)
    if is_v5e:
        # v5e: 4x128^2 MXU (128 tiles already saturate it), lowest HBM BW -> wide
        # streaming seq tiles for kernels 1/3; 128 MiB VMEM.
        return dict(seq_tile=512, q_tile=128, k_tile=128, ff_tile=1024,
                    vmem_limit=64 * 1024 * 1024)
    # v6e (and unknown fallback): 2x256^2 MXU, 128 MiB VMEM.
    return dict(seq_tile=512, q_tile=256, k_tile=256, ff_tile=1024,
                vmem_limit=64 * 1024 * 1024)


# -----------------------------------------------------------------------------
# Kernel 1: pre-LN + fused QKV projection, head-major (B, H, T, dh) outputs
# -----------------------------------------------------------------------------
def _ln_qkv_kernel(x_ref, g_ref, b_ref, wqkv_ref, bqkv_ref, q_ref, k_ref, v_ref):
    x = x_ref[0]                                       # (ts, D) f32
    xn = _layer_norm(x, g_ref[0], b_ref[0])            # f32
    y = jnp.dot(xn.astype(jnp.bfloat16), wqkv_ref[...],
                preferred_element_type=jnp.float32) + bqkv_ref[0]
    y = y.astype(q_ref.dtype)                          # (ts, 3D) bf16
    heads, dh = q_ref.shape[1], q_ref.shape[3]
    D = heads * dh
    # Static per-head relayout (lane slices) so the attention kernel needs no
    # wrapper-side transposes.
    for h in range(heads):
        q_ref[0, h] = y[:, h * dh:(h + 1) * dh]
        k_ref[0, h] = y[:, D + h * dh:D + (h + 1) * dh]
        v_ref[0, h] = y[:, 2 * D + h * dh:2 * D + (h + 1) * dh]


# -----------------------------------------------------------------------------
# Kernel 2: flash-style multi-head attention (online softmax over key tiles),
#           lane-dense merged-head (B, T, D) output
# -----------------------------------------------------------------------------
def _flash_attn_kernel(q_ref, k_ref, v_ref, bias_ref, o_ref, m_sc, l_sc, acc_sc):
    ki = pl.program_id(2)

    @pl.when(ki == 0)
    def _():
        m_sc[...] = jnp.full(m_sc.shape, -jnp.inf, jnp.float32)
        l_sc[...] = jnp.zeros(l_sc.shape, jnp.float32)
        acc_sc[...] = jnp.zeros(acc_sc.shape, jnp.float32)

    q = q_ref[0]                                       # (H, tq, dh) bf16; 1/sqrt(dh) pre-folded into Wq
    k = k_ref[0]                                       # (H, tk, dh) bf16
    v = v_ref[0]                                       # (H, tk, dh) bf16
    bias = bias_ref[0]                                 # (1, tk) f32, -1e9 at padded keys

    # Batched-over-heads MXU matmul, f32 accumulation.  No score scaling here:
    # the attention scale is folded into the Q projection weights.
    s = jnp.einsum('hqd,hkd->hqk', q, k, preferred_element_type=jnp.float32)
    s = s + bias[None, :, :]                           # additive mask bias

    m_prev = m_sc[...]
    m_new = jnp.maximum(m_prev, s.max(axis=-1, keepdims=True))
    alpha = jnp.exp(m_prev - m_new)
    p = jnp.exp(s - m_new)
    # TODO(synk): attention-probability dropout omitted (eval-mode identity).
    l_sc[...] = alpha * l_sc[...] + p.sum(axis=-1, keepdims=True)
    acc_sc[...] = alpha * acc_sc[...] + jnp.einsum(
        'hqk,hkd->hqd', p.astype(v.dtype), v,
        preferred_element_type=jnp.float32)
    m_sc[...] = m_new

    @pl.when(ki == pl.num_programs(2) - 1)
    def _():
        # Exact reciprocal (runs once per q-tile, negligible cost) for reference parity.
        o = acc_sc[...] / l_sc[...]                    # (H, tq, dh) f32
        heads = o.shape[0]
        # Merge heads in the epilogue -> lane-dense (tq, H*dh) store.
        o_ref[0] = jnp.concatenate(
            [o[h].astype(o_ref.dtype) for h in range(heads)], axis=-1)


# -----------------------------------------------------------------------------
# Kernel 3: output projection + residual + pre-LN + F-tiled FFN + residual
# -----------------------------------------------------------------------------
def _out_ffn_kernel(x_ref, ctx_ref, wo_ref, bo_ref, g2_ref, bln2_ref,
                    w1_ref, b1_ref, w2_ref, b2_ref, out_ref,
                    x1_sc, xn_sc, ffn_sc):
    f = pl.program_id(2)

    @pl.when(f == 0)
    def _():
        attn = jnp.dot(ctx_ref[0], wo_ref[...],
                       preferred_element_type=jnp.float32) + bo_ref[0]
        # TODO(synk): sublayer dropout omitted (eval-mode identity).
        x1 = x_ref[0] + attn                           # residual #1 (f32)
        x1_sc[...] = x1
        xn_sc[...] = _layer_norm(x1, g2_ref[0], bln2_ref[0]).astype(jnp.bfloat16)
        ffn_sc[...] = jnp.zeros_like(ffn_sc)

    # F-tiled FFN: h_f = relu(xn @ W1[:, f]); acc += h_f @ W2[f, :]
    h = jnp.dot(xn_sc[...], w1_ref[...],
                preferred_element_type=jnp.float32) + b1_ref[0]
    h = jnp.maximum(h, 0.0)                            # ReLU (f32)
    ffn_sc[...] += jnp.dot(h.astype(jnp.bfloat16), w2_ref[...],
                           preferred_element_type=jnp.float32)

    @pl.when(f == pl.num_programs(2) - 1)
    def _():
        out_ref[0] = (x1_sc[...] + ffn_sc[...] + b2_ref[0]).astype(out_ref.dtype)


# -----------------------------------------------------------------------------
# Wrapper
# -----------------------------------------------------------------------------
def transformer_encoder_layer(x, mask, params, *, heads,
                              seq_tile=None, q_tile=None, k_tile=None, ff_tile=None):
    """x: (B, T, D) f32; mask: (B, 1, T) f32 with 1.0 = padded key position.

    NOTE: params['wqkv'] / params['bqkv'] must have the 1/sqrt(dh) attention scale
    pre-folded into their Q columns (see make_params)."""
    B, T, D = x.shape
    assert D % heads == 0
    dh = D // heads
    F = params['w1'].shape[1]

    cfg = _select_config()
    ts = min(seq_tile or cfg['seq_tile'], T)
    tq = min(q_tile or cfg['q_tile'], T)
    tk = min(k_tile or cfg['k_tile'], T)
    tf = min(ff_tile or cfg['ff_tile'], F)
    vmem_limit = cfg['vmem_limit']
    assert T % ts == 0 and T % tq == 0 and T % tk == 0 and F % tf == 0

    head_shape = jax.ShapeDtypeStruct((B, heads, T, dh), jnp.bfloat16)

    # ---- kernel 1: LN1 + fused QKV projection (head-major outputs) ----------
    qh, kh, vh = pl.pallas_call(
        _ln_qkv_kernel,
        out_shape=(head_shape, head_shape, head_shape),
        grid=(B, T // ts),
        in_specs=[
            pl.BlockSpec((1, ts, D), lambda b, i: (b, i, 0)),       # x
            pl.BlockSpec((1, D), lambda b, i: (0, 0)),              # ln1 gamma
            pl.BlockSpec((1, D), lambda b, i: (0, 0)),              # ln1 beta
            pl.BlockSpec((D, 3 * D), lambda b, i: (0, 0)),          # Wqkv (bf16, Q scaled)
            pl.BlockSpec((1, 3 * D), lambda b, i: (0, 0)),          # bqkv (f32, Q scaled)
        ],
        out_specs=[
            pl.BlockSpec((1, heads, ts, dh), lambda b, i: (b, 0, i, 0)),
            pl.BlockSpec((1, heads, ts, dh), lambda b, i: (b, 0, i, 0)),
            pl.BlockSpec((1, heads, ts, dh), lambda b, i: (b, 0, i, 0)),
        ],
        compiler_params=pltpu.CompilerParams(
            dimension_semantics=("parallel", "parallel"),
            vmem_limit_bytes=vmem_limit),
    )(x, params['ln1_g'], params['ln1_b'], params['wqkv'], params['bqkv'])

    # Additive attention bias: one multiply per layer instead of where/select per tile.
    attn_bias = mask.astype(jnp.float32) * jnp.float32(-1e9)        # (B, 1, T)

    # ---- kernel 2: flash attention, merged-head lane-dense output ------------
    n_q = T // tq
    cost = pl.CostEstimate(
        flops=4 * B * heads * T * T * dh,
        transcendentals=B * heads * T * T,
        bytes_accessed=(2 * B * T * D * 2            # Q read + merged ctx write (bf16)
                        + 2 * n_q * B * T * D * 2    # K + V re-streamed once per q-tile
                        + n_q * B * T * 4))          # additive bias per q-tile (f32)

    ctx = pl.pallas_call(
        _flash_attn_kernel,
        out_shape=jax.ShapeDtypeStruct((B, T, D), jnp.bfloat16),
        grid=(B, n_q, T // tk),
        in_specs=[
            pl.BlockSpec((1, heads, tq, dh), lambda b, qi, ki: (b, 0, qi, 0)),   # Q
            pl.BlockSpec((1, heads, tk, dh), lambda b, qi, ki: (b, 0, ki, 0)),   # K
            pl.BlockSpec((1, heads, tk, dh), lambda b, qi, ki: (b, 0, ki, 0)),   # V
            pl.BlockSpec((1, 1, tk), lambda b, qi, ki: (b, 0, ki)),              # bias
        ],
        out_specs=pl.BlockSpec((1, tq, D), lambda b, qi, ki: (b, qi, 0)),
        scratch_shapes=[
            pltpu.VMEM((heads, tq, 1), jnp.float32),    # running max (lane-padded; OK at these sizes)
            pltpu.VMEM((heads, tq, 1), jnp.float32),    # running sum
            pltpu.VMEM((heads, tq, dh), jnp.float32),   # accumulator
        ],
        compiler_params=pltpu.CompilerParams(
            dimension_semantics=("parallel", "parallel", "arbitrary"),
            vmem_limit_bytes=vmem_limit),
        cost_estimate=cost,
    )(qh, kh, vh, attn_bias)

    # ---- kernel 3: out-proj + residual + LN2 + F-tiled FFN + residual --------
    out = pl.pallas_call(
        _out_ffn_kernel,
        out_shape=jax.ShapeDtypeStruct((B, T, D), jnp.float32),
        grid=(B, T // ts, F // tf),
        in_specs=[
            pl.BlockSpec((1, ts, D), lambda b, i, f: (b, i, 0)),    # x (residual)
            pl.BlockSpec((1, ts, D), lambda b, i, f: (b, i, 0)),    # ctx (bf16)
            pl.BlockSpec((D, D), lambda b, i, f: (0, 0)),           # Wo (bf16)
            pl.BlockSpec((1, D), lambda b, i, f: (0, 0)),           # bo
            pl.BlockSpec((1, D), lambda b, i, f: (0, 0)),           # ln2 gamma
            pl.BlockSpec((1, D), lambda b, i, f: (0, 0)),           # ln2 beta
            pl.BlockSpec((D, tf), lambda b, i, f: (0, f)),          # W1 tile (bf16)
            pl.BlockSpec((1, tf), lambda b, i, f: (0, f)),          # b1 tile
            pl.BlockSpec((tf, D), lambda b, i, f: (f, 0)),          # W2 tile (bf16)
            pl.BlockSpec((1, D), lambda b, i, f: (0, 0)),           # b2
        ],
        out_specs=pl.BlockSpec((1, ts, D), lambda b, i, f: (b, i, 0)),
        scratch_shapes=[
            pltpu.VMEM((ts, D), jnp.float32),      # x1 residual
            pltpu.VMEM((ts, D), jnp.bfloat16),     # LN2 output (reused across f-tiles)
            pltpu.VMEM((ts, D), jnp.float32),      # FFN accumulator
        ],
        compiler_params=pltpu.CompilerParams(
            dimension_semantics=("parallel", "parallel", "arbitrary"),
            vmem_limit_bytes=vmem_limit),
    )(x, ctx, params['wo'], params['bo'], params['ln2_g'], params['ln2_b'],
      params['w1'], params['b1'], params['w2'], params['b2'])

    return out


def make_params(key, d_model, d_ff, heads):
    ks = jax.random.split(key, 6)
    s = 0.02
    dh = d_model // heads
    scale = jnp.float32(1.0 / math.sqrt(dh))
    wq = s * jax.random.normal(ks[0], (d_model, d_model), jnp.float32)
    wk = s * jax.random.normal(ks[1], (d_model, d_model), jnp.float32)
    wv = s * jax.random.normal(ks[2], (d_model, d_model), jnp.float32)
    bq = jnp.zeros((d_model,), jnp.float32)
    bk = jnp.zeros((d_model,), jnp.float32)
    bv = jnp.zeros((d_model,), jnp.float32)
    # Fold the 1/sqrt(dh) attention scale into the Q projection (zero runtime cost).
    wq = wq * scale
    bq = bq * scale
    return {
        'ln1_g': jnp.ones((1, d_model), jnp.float32),
        'ln1_b': jnp.zeros((1, d_model), jnp.float32),
        # Fused QKV weight, stored bf16 (MXU-native, halves weight VMEM/HBM traffic).
        'wqkv': jnp.concatenate([wq, wk, wv], axis=1).astype(jnp.bfloat16),
        'bqkv': jnp.concatenate([bq, bk, bv])[None, :].astype(jnp.float32),
        'wo': (s * jax.random.normal(ks[3], (d_model, d_model),
                                     jnp.float32)).astype(jnp.bfloat16),
        'bo': jnp.zeros((1, d_model), jnp.float32),
        'ln2_g': jnp.ones((1, d_model), jnp.float32),
        'ln2_b': jnp.zeros((1, d_model), jnp.float32),
        'w1': (s * jax.random.normal(ks[4], (d_model, d_ff),
                                     jnp.float32)).astype(jnp.bfloat16),
        'b1': jnp.zeros((1, d_ff), jnp.float32),
        'w2': (s * jax.random.normal(ks[5], (d_ff, d_model),
                                     jnp.float32)).astype(jnp.bfloat16),
        'b2': jnp.zeros((1, d_model), jnp.float32),
    }


if __name__ == "__main__":
    B, T, D, H, F = 2, 8, 32, 4, 64

    key = jax.random.PRNGKey(0)
    kx, kp = jax.random.split(key)

    x = jax.random.normal(kx, (B, T, D), jnp.float32)
    # mask: 1.0 = padded key position.  Batch 0: no padding; batch 1: last 3 padded.
    mask = jnp.zeros((B, 1, T), jnp.float32)
    mask = mask.at[1, 0, T - 3:].set(1.0)

    params = make_params(kp, D, F, H)

    out = transformer_encoder_layer(x, mask, params, heads=H)
    jax.block_until_ready(out)

    assert out.shape == (B, T, D) and out.dtype == jnp.float32
    assert bool(jnp.all(jnp.isfinite(out)))
    print("KERNEL_OK")
</pallas_src>

<mosaic_0001>
module attributes {stable_mosaic.version = 11 : i64} {
  func.func @_ln_qkv_kernel(%arg0: i32, %arg1: i32, %arg2: memref<1x8x32xf32, #tpu.memory_space<vmem>>, %arg3: memref<1x32xf32, #tpu.memory_space<vmem>>, %arg4: memref<1x32xf32, #tpu.memory_space<vmem>>, %arg5: memref<32x96xbf16, #tpu.memory_space<vmem>>, %arg6: memref<1x96xf32, #tpu.memory_space<vmem>>, %arg7: memref<1x4x8x8xbf16, #tpu.memory_space<vmem>>, %arg8: memref<1x4x8x8xbf16, #tpu.memory_space<vmem>>, %arg9: memref<1x4x8x8xbf16, #tpu.memory_space<vmem>>) attributes {dimension_semantics = [#tpu.dimension_semantics<parallel>, #tpu.dimension_semantics<parallel>], iteration_bounds = array<i64: 2, 1>, scalar_prefetch = 0 : i64, scratch_operands = 0 : i64, tpu.core_type = #tpu.core_type<tc>, window_params = [{transform_indices = @transform_0, window_bounds = array<i64: 1, 8, 32>}, {pipeline_mode = #tpu.pipeline_mode<synchronous>, transform_indices = @transform_1, window_bounds = array<i64: 1, 32>}, {pipeline_mode = #tpu.pipeline_mode<synchronous>, transform_indices = @transform_2, window_bounds = array<i64: 1, 32>}, {pipeline_mode = #tpu.pipeline_mode<synchronous>, transform_indices = @transform_3, window_bounds = array<i64: 32, 96>}, {pipeline_mode = #tpu.pipeline_mode<synchronous>, transform_indices = @transform_4, window_bounds = array<i64: 1, 96>}, {transform_indices = @transform_5, window_bounds = array<i64: 1, 4, 8, 8>}, {transform_indices = @transform_6, window_bounds = array<i64: 1, 4, 8, 8>}, {transform_indices = @transform_7, window_bounds = array<i64: 1, 4, 8, 8>}]} {
    %c0 = arith.constant 0 : index
    %c0_0 = arith.constant 0 : index
    %c0_1 = arith.constant 0 : index
    %0 = vector.load %arg2[%c0, %c0_0, %c0_1] : memref<1x8x32xf32, #tpu.memory_space<vmem>>, vector<1x8x32xf32>
    %1 = vector.shape_cast %0 : vector<1x8x32xf32> to vector<8x32xf32>
    %c0_2 = arith.constant 0 : index
    %c0_3 = arith.constant 0 : index
    %2 = vector.load %arg3[%c0_2, %c0_3] : memref<1x32xf32, #tpu.memory_space<vmem>>, vector<1x32xf32>
    %3 = vector.shape_cast %2 : vector<1x32xf32> to vector<32xf32>
    %c0_4 = arith.constant 0 : index
    %c0_5 = arith.constant 0 : index
    %4 = vector.load %arg4[%c0_4, %c0_5] : memref<1x32xf32, #tpu.memory_space<vmem>>, vector<1x32xf32>
    %5 = vector.shape_cast %4 : vector<1x32xf32> to vector<32xf32>
    %cst = arith.constant dense<0.000000e+00> : vector<8xf32>
    %6 = vector.multi_reduction <add>, %1, %cst [1] : vector<8x32xf32> to vector<8xf32>
    %7 = vector.shape_cast %6 : vector<8xf32> to vector<8x1xf32>
    %cst_6 = arith.constant 3.200000e+01 : f32
    %8 = vector.broadcast %cst_6 : f32 to vector<8x1xf32>
    %9 = arith.divf %7, %8 : vector<8x1xf32>
    %10 = vector.broadcast %9 : vector<8x1xf32> to vector<8x32xf32>
    %11 = arith.subf %1, %10 : vector<8x32xf32>
    %12 = arith.mulf %11, %11 : vector<8x32xf32>
    %cst_7 = arith.constant dense<0.000000e+00> : vector<8xf32>
    %13 = vector.multi_reduction <add>, %12, %cst_7 [1] : vector<8x32xf32> to vector<8xf32>
    %14 = vector.shape_cast %13 : vector<8xf32> to vector<8x1xf32>
    %cst_8 = arith.constant 3.200000e+01 : f32
    %15 = vector.broadcast %cst_8 : f32 to vector<8x1xf32>
    %16 = arith.divf %14, %15 : vector<8x1xf32>
    %17 = vector.broadcast %9 : vector<8x1xf32> to vector<8x32xf32>
    %18 = arith.subf %1, %17 : vector<8x32xf32>
    %cst_9 = arith.constant 9.99999997E-7 : f32
    %19 = vector.broadcast %cst_9 : f32 to vector<8x1xf32>
    %20 = arith.addf %16, %19 : vector<8x1xf32>
    %21 = math.rsqrt %20 : vector<8x1xf32>
    %22 = vector.broadcast %21 : vector<8x1xf32> to vector<8x32xf32>
    %23 = arith.mulf %18, %22 : vector<8x32xf32>
    %24 = vector.shape_cast %3 : vector<32xf32> to vector<1x32xf32>
    %25 = vector.broadcast %24 : vector<1x32xf32> to vector<8x32xf32>
    %26 = arith.mulf %23, %25 : vector<8x32xf32>
    %27 = vector.shape_cast %5 : vector<32xf32> to vector<1x32xf32>
    %28 = vector.broadcast %27 : vector<1x32xf32> to vector<8x32xf32>
    %29 = arith.addf %26, %28 : vector<8x32xf32>
    %30 = arith.truncf %29 : vector<8x32xf32> to vector<8x32xbf16>
    %c0_10 = arith.constant 0 : index
    %c0_11 = arith.constant 0 : index
    %31 = vector.load %arg5[%c0_10, %c0_11] : memref<32x96xbf16, #tpu.memory_space<vmem>>, vector<32x96xbf16>
    %cst_12 = arith.constant dense<0.000000e+00> : vector<8x96xf32>
    %32 = tpu.matmul %30, %31, %cst_12 {dimension_numbers = #tpu.dot_dimension_numbers<[1], [0], [0], [1], [0, 0, 1, 1], [], []>} : vector<8x32xbf16>, vector<32x96xbf16>, vector<8x96xf32> -> vector<8x96xf32>
    %c0_13 = arith.constant 0 : index
    %c0_14 = arith.constant 0 : index
    %33 = vector.load %arg6[%c0_13, %c0_14] : memref<1x96xf32, #tpu.memory_space<vmem>>, vector<1x96xf32>
    %34 = vector.shape_cast %33 : vector<1x96xf32> to vector<96xf32>
    %35 = vector.shape_cast %34 : vector<96xf32> to vector<1x96xf32>
    %36 = vector.broadcast %35 : vector<1x96xf32> to vector<8x96xf32>
    %37 = arith.addf %32, %36 : vector<8x96xf32>
    %38 = arith.truncf %37 : vector<8x96xf32> to vector<8x96xbf16>
    %39 = vector.extract_strided_slice %38 {offsets = [0, 0], sizes = [8, 8], strides = [1, 1]} : vector<8x96xbf16> to vector<8x8xbf16>
    %c0_15 = arith.constant 0 : index
    %c0_16 = arith.constant 0 : index
    %c0_17 = arith.constant 0 : index
    %c0_18 = arith.constant 0 : index
    %40 = vector.load %arg7[%c0_15, %c0_16, %c0_17, %c0_18] : memref<1x4x8x8xbf16, #tpu.memory_space<vmem>>, vector<1x1x8x8xbf16>
    %41 = vector.shape_cast %40 : vector<1x1x8x8xbf16> to vector<8x8xbf16>
    %42 = vector.shape_cast %39 : vector<8x8xbf16> to vector<1x1x8x8xbf16>
    tpu.vector_store %arg7[%c0_15, %c0_16, %c0_17, %c0_18], %42 {strides = array<i32>} : memref<1x4x8x8xbf16, #tpu.memory_space<vmem>>, vector<1x1x8x8xbf16>,
    %43 = vector.extract_strided_slice %38 {offsets = [0, 32], sizes = [8, 8], strides = [1, 1]} : vector<8x96xbf16> to vector<8x8xbf16>
    %c0_19 = arith.constant 0 : index
    %c0_20 = arith.constant 0 : index
    %c0_21 = arith.constant 0 : index
    %c0_22 = arith.constant 0 : index
    %44 = vector.load %arg8[%c0_19, %c0_20, %c0_21, %c0_22] : memref<1x4x8x8xbf16, #tpu.memory_space<vmem>>, vector<1x1x8x8xbf16>
    %45 = vector.shape_cast %44 : vector<1x1x8x8xbf16> to vector<8x8xbf16>
    %46 = vector.shape_cast %43 : vector<8x8xbf16> to vector<1x1x8x8xbf16>
    tpu.vector_store %arg8[%c0_19, %c0_20, %c0_21, %c0_22], %46 {strides = array<i32>} : memref<1x4x8x8xbf16, #tpu.memory_space<vmem>>, vector<1x1x8x8xbf16>,
    %47 = vector.extract_strided_slice %38 {offsets = [0, 64], sizes = [8, 8], strides = [1, 1]} : vector<8x96xbf16> to vector<8x8xbf16>
    %c0_23 = arith.constant 0 : index
    %c0_24 = arith.constant 0 : index
    %c0_25 = arith.constant 0 : index
    %c0_26 = arith.constant 0 : index
    %48 = vector.load %arg9[%c0_23, %c0_24, %c0_25, %c0_26] : memref<1x4x8x8xbf16, #tpu.memory_space<vmem>>, vector<1x1x8x8xbf16>
    %49 = vector.shape_cast %48 : vector<1x1x8x8xbf16> to vector<8x8xbf16>
    %50 = vector.shape_cast %47 : vector<8x8xbf16> to vector<1x1x8x8xbf16>
    tpu.vector_store %arg9[%c0_23, %c0_24, %c0_25, %c0_26], %50 {strides = array<i32>} : memref<1x4x8x8xbf16, #tpu.memory_space<vmem>>, vector<1x1x8x8xbf16>,
    %51 = vector.extract_strided_slice %38 {offsets = [0, 8], sizes = [8, 8], strides = [1, 1]} : vector<8x96xbf16> to vector<8x8xbf16>
    %c0_27 = arith.constant 0 : index
    %c1 = arith.constant 1 : index
    %c0_28 = arith.constant 0 : index
    %c0_29 = arith.constant 0 : index
    %52 = vector.load %arg7[%c0_27, %c1, %c0_28, %c0_29] : memref<1x4x8x8xbf16, #tpu.memory_space<vmem>>, vector<1x1x8x8xbf16>
    %53 = vector.shape_cast %52 : vector<1x1x8x8xbf16> to vector<8x8xbf16>
    %54 = vector.shape_cast %51 : vector<8x8xbf16> to vector<1x1x8x8xbf16>
    tpu.vector_store %arg7[%c0_27, %c1, %c0_28, %c0_29], %54 {strides = array<i32>} : memref<1x4x8x8xbf16, #tpu.memory_space<vmem>>, vector<1x1x8x8xbf16>,
    %55 = vector.extract_strided_slice %38 {offsets = [0, 40], sizes = [8, 8], strides = [1, 1]} : vector<8x96xbf16> to vector<8x8xbf16>
    %c0_30 = arith.constant 0 : index
    %c1_31 = arith.constant 1 : index
    %c0_32 = arith.constant 0 : index
    %c0_33 = arith.constant 0 : index
    %56 = vector.load %arg8[%c0_30, %c1_31, %c0_32, %c0_33] : memref<1x4x8x8xbf16, #tpu.memory_space<vmem>>, vector<1x1x8x8xbf16>
    %57 = vector.shape_cast %56 : vector<1x1x8x8xbf16> to vector<8x8xbf16>
    %58 = vector.shape_cast %55 : vector<8x8xbf16> to vector<1x1x8x8xbf16>
    tpu.vector_store %arg8[%c0_30, %c1_31, %c0_32, %c0_33], %58 {strides = array<i32>} : memref<1x4x8x8xbf16, #tpu.memory_space<vmem>>, vector<1x1x8x8xbf16>,
    %59 = vector.extract_strided_slice %38 {offsets = [0, 72], sizes = [8, 8], strides = [1, 1]} : vector<8x96xbf16> to vector<8x8xbf16>
    %c0_34 = arith.constant 0 : index
    %c1_35 = arith.constant 1 : index
    %c0_36 = arith.constant 0 : index
    %c0_37 = arith.constant 0 : index
    %60 = vector.load %arg9[%c0_34, %c1_35, %c0_36, %c0_37] : memref<1x4x8x8xbf16, #tpu.memory_space<vmem>>, vector<1x1x8x8xbf16>
    %61 = vector.shape_cast %60 : vector<1x1x8x8xbf16> to vector<8x8xbf16>
    %62 = vector.shape_cast %59 : vector<8x8xbf16> to vector<1x1x8x8xbf16>
    tpu.vector_store %arg9[%c0_34, %c1_35, %c0_36, %c0_37], %62 {strides = array<i32>} : memref<1x4x8x8xbf16, #tpu.memory_space<vmem>>, vector<1x1x8x8xbf16>,
    %63 = vector.extract_strided_slice %38 {offsets = [0, 16], sizes = [8, 8], strides = [1, 1]} : vector<8x96xbf16> to vector<8x8xbf16>
    %c0_38 = arith.constant 0 : index
    %c2 = arith.constant 2 : index
    %c0_39 = arith.constant 0 : index
    %c0_40 = arith.constant 0 : index
    %64 = vector.load %arg7[%c0_38, %c2, %c0_39, %c0_40] : memref<1x4x8x8xbf16, #tpu.memory_space<vmem>>, vector<1x1x8x8xbf16>
    %65 = vector.shape_cast %64 : vector<1x1x8x8xbf16> to vector<8x8xbf16>
    %66 = vector.shape_cast %63 : vector<8x8xbf16> to vector<1x1x8x8xbf16>
    tpu.vector_store %arg7[%c0_38, %c2, %c0_39, %c0_40], %66 {strides = array<i32>} : memref<1x4x8x8xbf16, #tpu.memory_space<vmem>>, vector<1x1x8x8xbf16>,
    %67 = vector.extract_strided_slice %38 {offsets = [0, 48], sizes = [8, 8], strides = [1, 1]} : vector<8x96xbf16> to vector<8x8xbf16>
    %c0_41 = arith.constant 0 : index
    %c2_42 = arith.constant 2 : index
    %c0_43 = arith.constant 0 : index
    %c0_44 = arith.constant 0 : index
    %68 = vector.load %arg8[%c0_41, %c2_42, %c0_43, %c0_44] : memref<1x4x8x8xbf16, #tpu.memory_space<vmem>>, vector<1x1x8x8xbf16>
    %69 = vector.shape_cast %68 : vector<1x1x8x8xbf16> to vector<8x8xbf16>
    %70 = vector.shape_cast %67 : vector<8x8xbf16> to vector<1x1x8x8xbf16>
    tpu.vector_store %arg8[%c0_41, %c2_42, %c0_43, %c0_44], %70 {strides = array<i32>} : memref<1x4x8x8xbf16, #tpu.memory_space<vmem>>, vector<1x1x8x8xbf16>,
    %71 = vector.extract_strided_slice %38 {offsets = [0, 80], sizes = [8, 8], strides = [1, 1]} : vector<8x96xbf16> to vector<8x8xbf16>
    %c0_45 = arith.constant 0 : index
    %c2_46 = arith.constant 2 : index
    %c0_47 = arith.constant 0 : index
    %c0_48 = arith.constant 0 : index
    %72 = vector.load %arg9[%c0_45, %c2_46, %c0_47, %c0_48] : memref<1x4x8x8xbf16, #tpu.memory_space<vmem>>, vector<1x1x8x8xbf16>
    %73 = vector.shape_cast %72 : vector<1x1x8x8xbf16> to vector<8x8xbf16>
    %74 = vector.shape_cast %71 : vector<8x8xbf16> to vector<1x1x8x8xbf16>
    tpu.vector_store %arg9[%c0_45, %c2_46, %c0_47, %c0_48], %74 {strides = array<i32>} : memref<1x4x8x8xbf16, #tpu.memory_space<vmem>>, vector<1x1x8x8xbf16>,
    %75 = vector.extract_strided_slice %38 {offsets = [0, 24], sizes = [8, 8], strides = [1, 1]} : vector<8x96xbf16> to vector<8x8xbf16>
    %c0_49 = arith.constant 0 : index
    %c3 = arith.constant 3 : index
    %c0_50 = arith.constant 0 : index
    %c0_51 = arith.constant 0 : index
    %76 = vector.load %arg7[%c0_49, %c3, %c0_50, %c0_51] : memref<1x4x8x8xbf16, #tpu.memory_space<vmem>>, vector<1x1x8x8xbf16>
    %77 = vector.shape_cast %76 : vector<1x1x8x8xbf16> to vector<8x8xbf16>
    %78 = vector.shape_cast %75 : vector<8x8xbf16> to vector<1x1x8x8xbf16>
    tpu.vector_store %arg7[%c0_49, %c3, %c0_50, %c0_51], %78 {strides = array<i32>} : memref<1x4x8x8xbf16, #tpu.memory_space<vmem>>, vector<1x1x8x8xbf16>,
    %79 = vector.extract_strided_slice %38 {offsets = [0, 56], sizes = [8, 8], strides = [1, 1]} : vector<8x96xbf16> to vector<8x8xbf16>
    %c0_52 = arith.constant 0 : index
    %c3_53 = arith.constant 3 : index
    %c0_54 = arith.constant 0 : index
    %c0_55 = arith.constant 0 : index
    %80 = vector.load %arg8[%c0_52, %c3_53, %c0_54, %c0_55] : memref<1x4x8x8xbf16, #tpu.memory_space<vmem>>, vector<1x1x8x8xbf16>
    %81 = vector.shape_cast %80 : vector<1x1x8x8xbf16> to vector<8x8xbf16>
    %82 = vector.shape_cast %79 : vector<8x8xbf16> to vector<1x1x8x8xbf16>
    tpu.vector_store %arg8[%c0_52, %c3_53, %c0_54, %c0_55], %82 {strides = array<i32>} : memref<1x4x8x8xbf16, #tpu.memory_space<vmem>>, vector<1x1x8x8xbf16>,
    %83 = vector.extract_strided_slice %38 {offsets = [0, 88], sizes = [8, 8], strides = [1, 1]} : vector<8x96xbf16> to vector<8x8xbf16>
    %c0_56 = arith.constant 0 : index
    %c3_57 = arith.constant 3 : index
    %c0_58 = arith.constant 0 : index
    %c0_59 = arith.constant 0 : index
    %84 = vector.load %arg9[%c0_56, %c3_57, %c0_58, %c0_59] : memref<1x4x8x8xbf16, #tpu.memory_space<vmem>>, vector<1x1x8x8xbf16>
    %85 = vector.shape_cast %84 : vector<1x1x8x8xbf16> to vector<8x8xbf16>
    %86 = vector.shape_cast %83 : vector<8x8xbf16> to vector<1x1x8x8xbf16>
    tpu.vector_store %arg9[%c0_56, %c3_57, %c0_58, %c0_59], %86 {strides = array<i32>} : memref<1x4x8x8xbf16, #tpu.memory_space<vmem>>, vector<1x1x8x8xbf16>,
    return
  }
  func.func @transform_0(%arg0: i32, %arg1: i32) -> (i32, i32, i32) {
    %c0_i32 = arith.constant 0 : i32
    %c0_i32_0 = arith.constant 0 : i32
    return %arg0, %arg1, %c0_i32 : i32, i32, i32
  }
  func.func @transform_1(%arg0: i32, %arg1: i32) -> (i32, i32) {
    %c0_i32 = arith.constant 0 : i32
    %c0_i32_0 = arith.constant 0 : i32
    %c0_i32_1 = arith.constant 0 : i32
    return %c0_i32, %c0_i32_0 : i32, i32
  }
  func.func @transform_2(%arg0: i32, %arg1: i32) -> (i32, i32) {
    %c0_i32 = arith.constant 0 : i32
    %c0_i32_0 = arith.constant 0 : i32
    %c0_i32_1 = arith.constant 0 : i32
    return %c0_i32, %c0_i32_0 : i32, i32
  }
  func.func @transform_3(%arg0: i32, %arg1: i32) -> (i32, i32) {
    %c0_i32 = arith.constant 0 : i32
    %c0_i32_0 = arith.constant 0 : i32
    %c0_i32_1 = arith.constant 0 : i32
    return %c0_i32, %c0_i32_0 : i32, i32
  }
  func.func @transform_4(%arg0: i32, %arg1: i32) -> (i32, i32) {
    %c0_i32 = arith.constant 0 : i32
    %c0_i32_0 = arith.constant 0 : i32
    %c0_i32_1 = arith.constant 0 : i32
    return %c0_i32, %c0_i32_0 : i32, i32
  }
  func.func @transform_5(%arg0: i32, %arg1: i32) -> (i32, i32, i32, i32) {
    %c0_i32 = arith.constant 0 : i32
    %c0_i32_0 = arith.constant 0 : i32
    %c0_i32_1 = arith.constant 0 : i32
    return %arg0, %c0_i32, %arg1, %c0_i32_0 : i32, i32, i32, i32
  }
  func.func @transform_6(%arg0: i32, %arg1: i32) -> (i32, i32, i32, i32) {
    %c0_i32 = arith.constant 0 : i32
    %c0_i32_0 = arith.constant 0 : i32
    %c0_i32_1 = arith.constant 0 : i32
    return %arg0, %c0_i32, %arg1, %c0_i32_0 : i32, i32, i32, i32
  }
  func.func @transform_7(%arg0: i32, %arg1: i32) -> (i32, i32, i32, i32) {
    %c0_i32 = arith.constant 0 : i32
    %c0_i32_0 = arith.constant 0 : i32
    %c0_i32_1 = arith.constant 0 : i32
    return %arg0, %c0_i32, %arg1, %c0_i32_0 : i32, i32, i32, i32
  }
}

</mosaic_0001>

<bundles_post_ra>
// kernel: tpu_custom_call.1
= control target key start
LH: loop header
LB: loop body
LE: loop exit
PB: predicated region body
PF: predicated region fallthrough
CT: control target
= control target key end

     0   :  { %s1437_s0 = inlined_call_operand.hbm [shape: f32[2,8,32], index: 0, kind: input, shape index: {}]   ;;  %s1438_s1 = inlined_call_operand.vmem [shape: f32[1,32], index: 1, kind: input, shape index: {}]   ;;  %s1439_s2 = inlined_call_operand.vmem [shape: f32[1,32], index: 2, kind: input, shape index: {}]   ;;  %s1440_s3 = inlined_call_operand.hbm [shape: bf16[32,96], index: 3, kind: input, shape index: {}]   ;;  %s1441_s4 = inlined_call_operand.vmem [shape: f32[1,96], index: 4, kind: input, shape index: {}]   ;;  %s1442_s5 = inlined_call_operand.hbm [shape: bf16[2,4,8,8], index: 5, kind: output, shape index: {0}]   ;;  %s1443_s6 = inlined_call_operand.hbm [shape: bf16[2,4,8,8], index: 6, kind: output, shape index: {1}]   ;;  %s1444_s7 = inlined_call_operand.hbm [shape: bf16[2,4,8,8], index: 7, kind: output, shape index: {2}]  }
   0x1   :  { %1450 = sst [smem:[#allocation18_spill]] %s1440_s3 }
   0x2   :  { %13 = vsyncpa [#allocation3], 0 }
   0x3   :  { %15 = vsyncpa [#allocation3 + $0x1], 0 }
   0x4   :  { %16 = vsyncpa [#allocation6], 0 }
   0x5   :  { %17 = vsyncpa [#allocation4], 0 }
   0x6   :  { %19 = vsyncpa [#allocation4 + $0x1], 0 }
   0x7   :  { %20 = vsyncpa [#allocation9], 0 }
   0x8   :  { %22 = vsyncpa [#allocation9 + $0x1], 0  ;;  %s1140_s24 = smov 0   ;;  %s1142_s25 = smov 0  }
   0x9   :  { %s1144_s26 = smov 0   ;;  %s1146_s27 = smov 0  }
   0xa   :  { %s1148_s28 = smov 0   ;;  %s1150_s29 = smov 0  }
   0xb LB: > { %1451 = sst [smem:[#allocation15_spill]] %s1073_s28  ;;  %s1171_s30 = sadd.s32 4294967295, %s1077_s29   ;;  %s1077_s29 = sphi %s1150_s29, %s28_s29   ;;  %s1073_s28 = sphi %s1148_s28, %s1470_s28   ;;  %s1069_s27 = sphi %s1146_s27, %s1469_s27   ;;  %s1065_s26 = sphi %s1144_s26, %s1473_s26   ;;  %s1061_s25 = sphi %s1142_s25, %s1472_s25   ;;  %s1057_s24 = sphi %s1140_s24, %s1471_s24  }
   0xc   : > { %s1445_s8 = sadd.s32 4294967294, %s1077_s29   ;;  %p62_p0 = scmp.ne.s32.totalorder %s1061_s25, %s1057_s24 }
   0xd   : > { %p1449_p1 = scmp.eq.s32.totalorder %s1171_s30, 0  ;;  %p178_p3 = scmp.eq.s32.totalorder %s1445_s8, 1 }
   0xe   : > { %p727_p5 = scmp.ge.s32.totalorder %s1077_s29, 1  ;;  %p241_p7 = scmp.lt.s32.totalorder %s1077_s29, 3 }
   0xf   : > { %p1182_p4 = por %p1449_p1, %p62_p0  ;;  %p1187_p6 = por %p178_p3, %p62_p0 }
  0x10   : > { %p1192_p8 = pnand %p727_p5, %p241_p7  ;;  %s1079_s12 = smov [#allocation5]  }
  0x11   : > { %s1453_s10 = scalar_select %p1187_p6, 1, 0 }
  0x12   : > { %s259_s13 = sshll.u32 %s1079_s12, 4  ;;  %p792_p9 = pneg %p1192_p8  ;;  %s260_s13 = int_to_ptr.vmem [resolvable:$true] %s259_s13 }
  0x13   : > { %1454 = sst [smem:[#allocation16_spill]] %s1453_s10  ;;  %s40_s15 = sadd.s32 1, %s1073_s28 }
  0x14   : > { %p1201_p11 = pnand %p792_p9, %p1449_p1  ;;  %s894_s16 = scalar_lea.vmem %s260_s13, 256 }
  0x15   : > { %p895_p13 = scmp.ne.s32.totalorder %s260_s13, %s894_s16  ;;  %p902_p5 = scmp.lt.s32.totalorder %s260_s13, %s260_s13 }
  0x16   : > { %p885_p12 = pneg %p1201_p11  ;;  %p903_p7 = scmp.lt.s32.totalorder %s894_s16, %s894_s16 }
  0x18   : > { %p897_p0 = pnand %p895_p13, %p885_p12  ;;  %p904_p2 = por %p903_p7, %p902_p5 }
  0x1a   : > { %p898_p3 = pneg %p897_p0 }
  0x1c   : > { %p905_p6 = pnand %p904_p2, %p898_p3 }
  0x1e   : > { %908 = shalt.err (!%p905_p6)
}
  0x1f   : > { %s1080_s17 = smov 64   ;;  %s1081_s18 = smov 4  }
  0x20   : > { %s1457_s3 = sld [smem:[#allocation18_spill]]  ;;  %p42_p2 = scmp.ge.s32.totalorder %s40_s15, 2 }
  0x21   : > { %s49_s21 = sadd.s32 1, %s1065_s26  ;;  %p56_p6 = scmp.ne.s32.totalorder %s1065_s26, %s1061_s25 }
  0x22   : > { %p57_p9 = scmp.eq.s32.totalorder %s1077_s29, 0  ;;  %s1475_s15 = smov (%p42_p2, %s40_s15), 0 }
  0x23   : > { %1458 = sst [smem:[#allocation17_spill]] %s1475_s15  ;;  %p1460_p13 = scmp.eq.s32.totalorder %s1171_s30, 1 }
  0x24   : > { %p1219_p12 = por %p57_p9, %p56_p6  ;;  %s44_s12 = ssub.s32 %s1073_s28, %s1475_s15 }
  0x25   : > { %p1225_p0 = por %p1460_p13, %p56_p6  ;;  %p811_p3 = scmp.lt.s32.totalorder %s1077_s29, 2 }
  0x26   : > { %795 = dma.hbm_to_vmem [thread:$0]  (!%p1201_p11), %s1457_s3, 256, %s260_s13, [#allocation6], %s1080_s17, %s1080_s17, %s1081_s18  }
  0x27   : > { %p47_p11 = scmp.eq.s32.totalorder %s44_s12, 0  ;;  %s276_s13 = sand.u32 1, %s1065_s26  }
  0x28   : > { %s730_s14 = sshll.u32 %s276_s13, 3  ;;  %s731_s17 = sshll.u32 %s1073_s28, 7 }
  0x29   : > { %s1234_s16 = scalar_select %p47_p11, %s1065_s26, %s49_s21  }
  0x2a   : > { %s286_s20 = scalar_lea.hbm %s1437_s0, %s731_s17  ;;  %s280_s8 = scalar_lea.vmem [#allocation2], %s730_s14 }
  0x2b   : > { %s288_s3 = sshll.u32 %s280_s8, 4  ;;  %p1242_p5 = pnand %p811_p3, %p1219_p12  ;;  %s289_s3 = int_to_ptr.vmem [resolvable:$true] %s288_s3 }
  0x2c   : > { %s277_s15 = scalar_lea.sflag [#allocation3], %s276_s13  ;;  %s922_s12 = scalar_lea.vmem %s289_s3, 128 }
  0x2d   : > { %p911_p7 = pneg %p1242_p5  ;;  %p923_p2 = scmp.ne.s32.totalorder %s289_s3, %s922_s12 }
  0x2e   : > { %s1082_s21 = smov [#allocation2]  }
  0x2f   : > { %p925_p6 = pnand %p923_p2, %p911_p7  ;;  %s927_s28 = sshll.u32 %s1082_s21, 4  ;;  %s928_s28 = int_to_ptr.vmem [resolvable:$false] %s927_s28 }
  0x30   : > { %s929_s17 = scalar_lea.vmem %s928_s28, 256  ;;  %p930_p13 = scmp.lt.s32.totalorder %s289_s3, %s928_s28 }
  0x31   : > { %p926_p9 = pneg %p925_p6  ;;  %p931_p11 = scmp.lt.s32.totalorder %s929_s17, %s922_s12 }
  0x33   : > { %p932_p10 = por %p931_p11, %p930_p13 }
  0x35   : > { %p933_p1 = pnand %p932_p10, %p926_p9 }
  0x37   : > { %936 = shalt.err (!%p933_p1)
}
  0x38   : > { %799 = dma.hbm_to_vmem [thread:$0]  (!%p1242_p5), %s286_s20, 128, %s289_s3, %s277_s15  }
  0x39   : > { %297 = sbr.rel (%p1192_p8) target bundleno = 757 (0x2f5), region = 40  ;;  %s1253_s8 = sand.u32 (!%p1192_p8), 1, %s1061_s25  }
  0x3a   : > { %s733_s22 = sshll.u32 (!%p1192_p8), %s1253_s8, 3  ;;  %s300_s13 = scalar_lea.sflag (!%p1192_p8), [#allocation3], %s1253_s8 }
  0x3b   : > { %s303_s14 = scalar_lea.vmem (!%p1192_p8), [#allocation2], %s733_s22 }
  0x3e   : > { %1040 = dma.done.wait (%p1182_p4), %s300_s13, 128  }
  0x3f   : > { %1042 = vsyncadd (%p1182_p4), %s300_s13, 4294967168  ;;  %p1463_p1 = scmp.eq.s32.totalorder %s1171_s30, 0 }
  0x41   : > { %1044 = dma.done.wait (%p1463_p1), [#allocation6], 256   ;;  %p1464_p10 = pmov %p1463_p1 }
  0x42   : > { %vm352_vm0 = vcmask 261120   ;;  %v349_v0 = vld [vmem:[%s303_s14] sm:$0xff]  ;;  %v879_v7 = vld [vmem:[#allocation5 + $0x8] sm:$0xff]   ;;  %v1083_v8 = vmov 0.0   ;;  %vm1084_vm1 = vmmov 0   ;;  %v880_v9 = vld [vmem:[#allocation5] sm:$0xff]  }
  0x43   : > { %1046 = vsyncadd (%p1464_p10), [#allocation6], 4294967040  ;;  %v353_v1 = vsel %vm352_vm0, %v349_v0, 0.0  ;;  %772 = vmatprep.subr.bf16.mxu0 %v1083_v8  ;;  %776 = vmatprep.mubr.msk.bf16.mxu0 %vm1084_vm1, %v1083_v8  ;;  %v738_v14 = vld [vmem:[%s1438_s1] ss:$0 sm:$0xff]  ;;  %s1278_s18 = sshll.u32 %s1253_s8, 4 }
  0x44   : > { %354 = vadd.xlane.f32.xlu0 %v353_v1  ;;  %773 = vmatpush3.bf16.msra.mxu0 %v879_v7  ;;  %v739_v16 = vld [vmem:[%s1439_s2] ss:$0 sm:$0xff]  ;;  %vm449_vm2 = vcmask 60416   ;;  %s1085_s19 = smov 80   ;;  %s1086_s20 = smov 96  }
  0x45   : > { %774 = vmatprep.subr.bf16.mxu0 %v1083_v8  ;;  %v740_v20 = vld [vmem:[%s1441_s4] ss:$0 sm:$0xff]  ;;  %s1281_s12 = scalar_lea.vmem [#allocation7], %s1278_s18  ;;  %s1087_s21 = smov 104  }
  0x46   : > { %s1088_s17 = smov 88   ;;  %s1089_s22 = smov 72  }
  0x47   : > { %s1090_s13 = smov 64   ;;  %s1091_s14 = smov 120  }
  0x48   : > { %775 = vmatpush3.bf16.msra.mxu0 %v880_v9  ;;  %s1092_s3 = smov 56   ;;  %s1093_s28 = smov 112  }
  0x49   : > { %s1094_s9 = smov 48   ;;  %s1095_s10 = smov 40  }
  0x4a   : > { %s340_s11 = scalar_lea.vmem [#allocation8], %s1278_s18 }
  0x4b   : > { %s549_s15 = sshll.u32 %s340_s11, 4  ;;  %s1296_s15 = int_to_ptr.vmem [resolvable:$true] %s549_s15 }
  0xcd   : > { %v355_v2 = vpop.xlane.xlu0 %354 }
  0xce   : > { %v357_v3 = vmul.f32 0.03125, %v355_v2 }
  0xd0   : > { %v358_v4 = vsub.f32 %v349_v0, %v357_v3 }
  0xd2   : > { %v359_v5 = vmul.f32 %v358_v4, %v358_v4 }
  0xd4   : > { %v360_v6 = vsel %vm352_vm0, %v359_v5, 0.0 }
  0xd5   : > { %361 = vadd.xlane.f32.xlu0 %v360_v6 }
 0x15e   : > { %v362_v10 = vpop.xlane.xlu0 %361 }
 0x15f   : > { %v363_v11 = vmul.f32 0.03125, %v362_v10 }
 0x161   : > { %v364_v12 = vadd.f32 1e-06, %v363_v11 }
 0x163   : > { %881 = vrsqrt.f32 %v364_v12 }
 0x170   : > { %v882_v13 = vpop.eup %881 }
 0x171   : > { %v366_v15 = vmul.f32 %v882_v13, %v358_v4 }
 0x173   : > { %v373_v17 = vmul.f32 %v738_v14, %v366_v15 }
 0x175   : > { %v380_v18 = vadd.f32 %v739_v16, %v373_v17 }
 0x177   : > { %v381_v19 = vpack.c.bf16 %v380_v18, %v380_v18 }
 0x179   : > { %777 = vmatmul.mubr.msk.bf16.vlgmr.msra.gmra.mxu0 %vm352_vm0, %v381_v19 }
 0x239   : > { %v442_v21 = vpop.f32.mrf.mxu0 }
 0x23a   : > { %v443_v22 = vadd.f32 %v740_v20, %v442_v21 }
 0x23b   : > { %v778_v23 = vpop.f32.mrf.mxu0 }
 0x23c   : > { %v448_v24 = vpack.c.bf16 %v443_v22, %v443_v22 }
 0x23d   : > { %v445_v25 = vpop.f32.mrf.mxu0 }
 0x23e   : > { %482 = vrot.lane.b32.xlu0 %v448_v24, %s1085_s19  ;;  %454 = vrot.lane.b32.xlu1 %v448_v24, %s1086_s20  ;;  %450 = vst.msk [vmem:[%s1281_s12] sm:$0xf] %vm449_vm2, %v448_v24  ;;  %s512_s19 = sand.u32 1, %s1171_s30   ;;  %s1291_s20 = sshll.u32 %s1069_s27, 8 }
 0x23f   : > { %v779_v26 = vpop.f32.mrf.mxu0  ;;  %s1305_s27 = scalar_lea.sflag [#allocation9], %s512_s19  ;;  %s937_s30 = scalar_lea.vmem %s1296_s15, 256 }
 0x240   : > { %p938_p4 = scmp.ne.s32.totalorder %s1296_s15, %s937_s30 }
 0x242   : > { %492 = vrot.lane.b32.xlu0 %v448_v24, %s1087_s21  ;;  %467 = vrot.lane.b32.xlu1 %v448_v24, %s1088_s17  ;;  %p939_p8 = pnand %p938_p4, %p1225_p0 }
 0x244   : > { %p940_p12 = pneg %p939_p8 }
 0x246   : > { %497 = vrot.lane.b32.xlu1 %v448_v24, %s1089_s22  ;;  %s1302_s22 = scalar_lea.hbm %s1443_s6, %s1291_s20 }
 0x24a   : > { %458 = vrot.lane.b32.xlu1 %v448_v24, %s1090_s13 }
 0x24e   : > { %462 = vrot.lane.b32.xlu1 %v448_v24, %s1091_s14  ;;  %s1096_s14 = smov [#allocation8]  }
 0x252   : > { %472 = vrot.lane.b32.xlu1 %v448_v24, %s1092_s3  ;;  %s941_s3 = sshll.u32 %s1096_s14, 4  ;;  %s942_s3 = int_to_ptr.vmem [resolvable:$false] %s941_s3 }
 0x253   : > { %p944_p3 = scmp.lt.s32.totalorder %s1296_s15, %s942_s3 }
 0x256   : > { %477 = vrot.lane.b32.xlu1 %v448_v24, %s1093_s28  ;;  %s943_s28 = scalar_lea.vmem %s942_s3, 512 }
 0x257   : > { %p945_p5 = scmp.lt.s32.totalorder %s943_s28, %s937_s30 }
 0x259   : > { %p946_p7 = por %p945_p5, %p944_p3 }
 0x25a   : > { %487 = vrot.lane.b32.xlu1 %v448_v24, %s1094_s9 }
 0x25b   : > { %p947_p2 = pnand %p946_p7, %p940_p12 }
 0x25e   : > { %502 = vrot.lane.b32.xlu1 %v448_v24, %s1095_s10 }
 0x2b0   : > { %v483_v27 = vpop.permute.xlu0 %482  ;;  %v455_v28 = vpop.permute.xlu1 %454 }
 0x2b1   : > { %749 = vst.msk [vmem:[%s340_s11 + $0x8] sm:$0xf] %vm449_vm2, %v483_v27  ;;  %457 = vst.msk [vmem:[%s340_s11] sm:$0xf] %vm449_vm2, %v455_v28 }
 0x2b4   : > { %v493_v29 = vpop.permute.xlu0 %492  ;;  %v468_v30 = vpop.permute.xlu1 %467 }
 0x2b5   : > { %751 = vst.msk [vmem:[%s1281_s12 + $0xc] sm:$0xf] %vm449_vm2, %v493_v29  ;;  %746 = vst.msk [vmem:[%s340_s11 + $0x4] sm:$0xf] %vm449_vm2, %v468_v30 }
 0x2b8   : > { %v498_v31 = vpop.permute.xlu1 %497 }
 0x2b9   : > { %752 = vst.msk [vmem:[%s340_s11 + $0xc] sm:$0xf] %vm449_vm2, %v498_v31 }
 0x2ba   : > { %950 = shalt.err (!%p947_p2)
}
 0x2bb   : > { %s951_s9 = scalar_lea.hbm %s1302_s22, 256  ;;  %s955_s19 = scalar_lea.hbm %s1443_s6, 512 }
 0x2bc   : > { %p952_p6 = scmp.ne.s32.totalorder %s1302_s22, %s951_s9  ;;  %p956_p11 = scmp.lt.s32.totalorder %s1302_s22, %s1443_s6 }
 0x2bd   : > { %p957_p1 = scmp.lt.s32.totalorder %s955_s19, %s951_s9 }
 0x2be   : > { %p953_p9 = pnand %p952_p6, %p1225_p0 }
 0x2bf   : > { %p958_p10 = por %p957_p1, %p956_p11 }
 0x2c0   : > { %p954_p13 = pneg %p953_p9 }
 0x2c2   : > { %p959_p4 = pnand %p958_p10, %p954_p13 }
 0x2c4   : > { %962 = shalt.err (!%p959_p4)
}
 0x2c5   : > { %s1097_s30 = smov 4   ;;  %v459_v32 = vpop.permute.xlu1 %458  ;;  %s1332_s14 = scalar_lea.vmem [#allocation10], %s1278_s18 }
 0x2c6   : > { %787 = dma.vmem_to_hbm [thread:$0]  (%p1225_p0), %s1296_s15, 256, %s1302_s22, %s1305_s27, %s1090_s13, %s1090_s13, %s1097_s30  }
 0x2c7   : > { %461 = vst.msk [vmem:[%s1332_s14] sm:$0xf] %vm449_vm2, %v459_v32  ;;  %s532_s3 = sshll.u32 %s1281_s12, 4  ;;  %s1347_s18 = scalar_lea.hbm %s1442_s5, %s1291_s20  ;;  %s1341_s3 = int_to_ptr.vmem [resolvable:$true] %s532_s3 }
 0x2c8   : > { %s508_s15 = scalar_lea.sflag [#allocation4], %s1253_s8  ;;  %s963_s22 = scalar_lea.vmem %s1341_s3, 256 }
 0x2c9   : > { %v463_v33 = vpop.permute.xlu1 %462  ;;  %p964_p8 = scmp.ne.s32.totalorder %s1341_s3, %s963_s22  ;;  %s1098_s10 = smov [#allocation7]  }
 0x2ca   : > { %745 = vst.msk [vmem:[%s1281_s12 + $0x4] sm:$0xf] %vm449_vm2, %v463_v33  ;;  %s967_s11 = sshll.u32 %s1098_s10, 4  ;;  %s968_s11 = int_to_ptr.vmem [resolvable:$false] %s967_s11 }
 0x2cb   : > { %p965_p12 = pnand %p964_p8, %p1225_p0  ;;  %s969_s19 = scalar_lea.vmem %s968_s11, 512 }
 0x2cc   : > { %p970_p5 = scmp.lt.s32.totalorder %s1341_s3, %s968_s11  ;;  %p971_p7 = scmp.lt.s32.totalorder %s969_s19, %s963_s22 }
 0x2cd   : > { %v473_v34 = vpop.permute.xlu1 %472  ;;  %p966_p3 = pneg %p965_p12 }
 0x2ce   : > { %747 = vst.msk [vmem:[%s1332_s14 + $0x4] sm:$0xf] %vm449_vm2, %v473_v34  ;;  %p972_p2 = por %p971_p7, %p970_p5 }
 0x2d0   : > { %p973_p6 = pnand %p972_p2, %p966_p3 }
 0x2d1   : > { %v478_v35 = vpop.permute.xlu1 %477 }
 0x2d2   : > { %748 = vst.msk [vmem:[%s1281_s12 + $0x8] sm:$0xf] %vm449_vm2, %v478_v35 }
 0x2d3   : > { %976 = shalt.err (!%p973_p6)
}
 0x2d4   : > { %s977_s12 = scalar_lea.hbm %s1347_s18, 256  ;;  %s981_s17 = scalar_lea.hbm %s1442_s5, 512 }
 0x2d5   : > { %p978_p9 = scmp.ne.s32.totalorder %s1347_s18, %s977_s12  ;;  %p982_p1 = scmp.lt.s32.totalorder %s1347_s18, %s1442_s5 }
 0x2d6   : > { %p983_p10 = scmp.lt.s32.totalorder %s981_s17, %s977_s12 }
 0x2d7   : > { %p979_p13 = pnand %p978_p9, %p1225_p0 }
 0x2d8   : > { %p984_p4 = por %p983_p10, %p982_p1 }
 0x2d9   : > { %p980_p11 = pneg %p979_p13 }
 0x2db   : > { %p985_p8 = pnand %p984_p4, %p980_p11 }
 0x2dd   : > { %988 = shalt.err (!%p985_p8)
}
 0x2de   : > { %786 = dma.vmem_to_hbm [thread:$0]  (%p1225_p0), %s1341_s3, 256, %s1347_s18, %s508_s15, %s1090_s13, %s1090_s13, %s1097_s30   ;;  %v488_v36 = vpop.permute.xlu1 %487 }
 0x2df   : > { %s566_s22 = sshll.u32 %s1332_s14, 4  ;;  %750 = vst.msk [vmem:[%s1332_s14 + $0x8] sm:$0xf] %vm449_vm2, %v488_v36  ;;  %s1384_s19 = scalar_lea.hbm %s1444_s7, %s1291_s20  ;;  %s1378_s22 = int_to_ptr.vmem [resolvable:$true] %s566_s22 }
 0x2e0   : > { %s989_s12 = scalar_lea.vmem %s1378_s22, 256  ;;  %s1099_s3 = smov [#allocation10]  }
 0x2e1   : > { %p990_p12 = scmp.ne.s32.totalorder %s1378_s22, %s989_s12  ;;  %s993_s18 = sshll.u32 %s1099_s3, 4  ;;  %s994_s18 = int_to_ptr.vmem [resolvable:$false] %s993_s18 }
 0x2e2   : > { %v503_v37 = vpop.permute.xlu1 %502  ;;  %s995_s15 = scalar_lea.vmem %s994_s18, 512  ;;  %p996_p7 = scmp.lt.s32.totalorder %s1378_s22, %s994_s18 }
 0x2e3   : > { %753 = vst.msk [vmem:[%s1332_s14 + $0xc] sm:$0xf] %vm449_vm2, %v503_v37  ;;  %p991_p3 = pnand %p990_p12, %p1225_p0  ;;  %p997_p2 = scmp.lt.s32.totalorder %s995_s15, %s989_s12 }
 0x2e5   : > { %p992_p5 = pneg %p991_p3  ;;  %p998_p6 = por %p997_p2, %p996_p7 }
 0x2e7   : > { %p999_p9 = pnand %p998_p6, %p992_p5 }
 0x2e9   : > { %1002 = shalt.err (!%p999_p9)
}
 0x2ea   : > { %s1003_s20 = scalar_lea.hbm %s1384_s19, 256  ;;  %s1007_s21 = scalar_lea.hbm %s1444_s7, 512 }
 0x2eb   : > { %p1004_p13 = scmp.ne.s32.totalorder %s1384_s19, %s1003_s20  ;;  %p1008_p10 = scmp.lt.s32.totalorder %s1384_s19, %s1444_s7 }
 0x2ec   : > { %p1009_p4 = scmp.lt.s32.totalorder %s1007_s21, %s1003_s20 }
 0x2ed   : > { %p1005_p11 = pnand %p1004_p13, %p1225_p0 }
 0x2ee   : > { %p1010_p8 = por %p1009_p4, %p1008_p10 }
 0x2ef   : > { %p1006_p1 = pneg %p1005_p11 }
 0x2f1   : > { %p1011_p12 = pnand %p1010_p8, %p1006_p1 }
 0x2f3   : > { %1014 = shalt.err (!%p1011_p12)
}
 0x2f4   : > { %788 = dma.vmem_to_hbm [thread:$0]  (%p1225_p0), %s1378_s22, 256, %s1384_s19, %s1305_s27, %s1090_s13, %s1090_s13, %s1097_s30  }
 0x2f5 PF: > { %s1465_s9 = sld [smem:[#allocation16_spill]]  ;;  %s581_s10 = sand.u32 1, %s1057_s24  }
 0x2f6   : > { %p1467_p5 = scmp.ge.s32.totalorder %s1077_s29, 2  ;;  %s582_s11 = scalar_lea.sflag [#allocation4], %s581_s10 }
 0x2fb   : > { %p1466_p3 = scmp.ne.s32.totalorder %s1465_s9, 0 }
 0x2fd   : > { %p801_p7 = pnand %p1467_p5, %p1466_p3 }
 0x2ff   : > { %p802_p2 = pneg %p801_p7 }
 0x301   : > { %1048 = dma.done.wait (%p802_p2), %s582_s11, 256  }
 0x302   : > { %1050 = vsyncadd (%p802_p2), %s582_s11, 4294967040  ;;  %s1468_s23 = sadd.s32 4294967294, %s1077_s29  }
 0x303   : > { %s590_s12 = sand.u32 1, %s1468_s23  }
 0x304   : > { %s591_s3 = scalar_lea.sflag [#allocation9], %s590_s12 }
 0x305   : > { %1052 = dma.done.wait (%p802_p2), %s591_s3, 512  }
 0x306   : > { %1054 = vsyncadd (%p802_p2), %s591_s3, 4294966784  ;;  %s28_s29 = sadd.s32 1, %s1077_s29   ;;  %s1469_s27 = sld [smem:[#allocation15_spill]] }
 0x307   : > { %p25_p0 = scmp.ge.s32.totalorder %s28_s29, 4   ;;  %s1470_s28 = sld [smem:[#allocation17_spill]] }
 0x308   : > { %s1471_s24 = smov %s1061_s25  ;;  %s1472_s25 = smov %s1065_s26 }
 0x309   : > { %s1473_s26 = smov %s1234_s16  ;;  %27 = sbr.rel (!%p25_p0) target bundleno = 11 (0xb), region = 130 }
 0x30e   :  { %605 = vsyncpa [#allocation3], 1 }
 0x30f   :  { %607 = vsyncpa [#allocation3 + $0x1], 1 }
 0x310   :  { %608 = vsyncpa [#allocation6], 1 }
 0x311   :  { %609 = vsyncpa [#allocation4], 1 }
 0x312   :  { %611 = vsyncpa [#allocation4 + $0x1], 1 }
 0x313   :  { %612 = vsyncpa [#allocation9], 1 }
 0x314   :  { %614 = vsyncpa [#allocation9 + $0x1], 1 }

</bundles_post_ra>
